<compile_context>
chip_gen: v7x
topology: tpu7x:2x2x1
jax: 0.10.0
libtpu: 0.0.40
codegen_flags: <defaults>
</compile_context>

<pallas_src>
import functools

import jax
import jax.numpy as jnp
from jax.experimental import pallas as pl
from jax.experimental.pallas import tpu as pltpu


_INPUT_VMEM_BUDGET = 24 * 1024 * 1024   # bytes for 2 inputs x 2 pipeline buffers
_VMEM_LIMIT = 32 * 1024 * 1024          # scoped VMEM limit, safe on v5e/v6e/v7x


def _round_up(x, m):
    return ((x + m - 1) // m) * m


def _pick_tile_n(n, c, itemsize):
    """Largest row tile whose double-buffered input blocks fit the VMEM budget."""
    per_row = 2 * 2 * c * itemsize            # 2 inputs, double-buffered
    tile = max(8, _INPUT_VMEM_BUDGET // per_row)
    tile = min(tile, 1024)                    # 512-1024 rows already saturate HBM roofline
    tile = min(tile, _round_up(n, 8))         # don't exceed the (sublane-padded) batch
    return max(8, (tile // 8) * 8)            # sublane multiple


def _kl_kernel(s_ref, t_ref, o_ref, *, inv_temp, n_rows, tile_n):
    i = pl.program_id(0)

    # Promote to f32; temperature handled as a constant multiply (single VALU op).
    s = s_ref[...].astype(jnp.float32) * inv_temp
    t = t_ref[...].astype(jnp.float32) * inv_temp

    # log_softmax(student / T) along classes (lane axis).
    s_shift = s - jnp.max(s, axis=-1, keepdims=True)
    log_q = s_shift - jnp.log(jnp.sum(jnp.exp(s_shift), axis=-1, keepdims=True))

    # Teacher softmax folded into a per-row scale:
    #   sum_c p_c (log p_c - log_q_c) = (sum_c e^{t_c} (t_c - log_q_c)) / Z - log Z
    # with t already max-shifted and Z = sum_c e^{t_c}.  Only (tile, 1) columns
    # ever see the normalization -- no full-tile p or log_p is materialized.
    t_shift = t - jnp.max(t, axis=-1, keepdims=True)
    t_exp = jnp.exp(t_shift)
    t_sum = jnp.sum(t_exp, axis=-1, keepdims=True)
    inner = jnp.sum(t_exp * (t_shift - log_q), axis=-1, keepdims=True)
    # approx=True is also fine here (per-row column only); exact keeps the test tight.
    row_kl = inner * pl.reciprocal(t_sum, approx=False) - jnp.log(t_sum)

    # Mask rows of a ragged final tile (block reads past N are padding).
    row_ids = i * tile_n + jax.lax.broadcasted_iota(jnp.int32, row_kl.shape, 0)
    row_kl = jnp.where(row_ids < n_rows, row_kl, 0.0)

    # One f32 partial sum per grid step; wrapper finishes the 'mean' reduction.
    o_ref[...] = jnp.sum(row_kl, axis=0, keepdims=True)


def interactive_kl_loss(student, teacher, temperature, *, tile_n=None):
    """student, teacher: (N, C) logits; softmax over dim=1. Returns scalar f32 loss."""
    assert student.shape == teacher.shape and student.ndim == 2
    n, c = student.shape
    itemsize = jnp.dtype(student.dtype).itemsize
    tile = tile_n if tile_n is not None else _pick_tile_n(n, c, itemsize)
    assert tile > 0 and tile % 8 == 0
    num_tiles = (n + tile - 1) // tile

    # TODO(synk): for C < 128 the class (lane) axis is under-occupied (~25% VPU/EUP
    # throughput); a transposed classes-on-sublanes layout or plain XLA is preferable
    # for such tiny widths.

    kernel = functools.partial(
        _kl_kernel,
        inv_temp=1.0 / float(temperature),
        n_rows=n,
        tile_n=tile,
    )

    cost = pl.CostEstimate(
        flops=8 * n * c,                     # shifts, exp args, fold multiply/adds
        transcendentals=2 * n * c + 4 * n,   # exp(s), exp(t) + per-row logs/recip
        bytes_accessed=2 * n * c * itemsize + num_tiles * 4,
    )

    partials = pl.pallas_call(
        kernel,
        out_shape=jax.ShapeDtypeStruct((num_tiles, 1, 1), jnp.float32),
        grid=(num_tiles,),
        in_specs=[
            pl.BlockSpec((tile, c), lambda i: (i, 0)),
            pl.BlockSpec((tile, c), lambda i: (i, 0)),
        ],
        # Leading (grid) dim squeezed; each step owns its own (1,1) partial block,
        # so the row axis is truly independent and can be split across TensorCores.
        out_specs=pl.BlockSpec((None, 1, 1), lambda i: (i, 0, 0)),
        compiler_params=pltpu.CompilerParams(
            dimension_semantics=("parallel",),   # v7x: both TCs run row tiles
            vmem_limit_bytes=_VMEM_LIMIT,
        ),
        cost_estimate=cost,
    )(student, teacher)

    # nn.KLDivLoss reduction='mean': mean over ALL N*C elements.
    return jnp.sum(partials) / jnp.float32(n * c)


def _reference(student, teacher, temperature):
    s = student.astype(jnp.float32) / temperature
    t = teacher.astype(jnp.float32) / temperature
    log_q = jax.nn.log_softmax(s, axis=1)
    p = jax.nn.softmax(t, axis=1)
    log_p = jax.nn.log_softmax(t, axis=1)
    return jnp.mean(p * (log_p - log_q))


if __name__ == "__main__":
    key = jax.random.PRNGKey(0)
    k1, k2 = jax.random.split(key)
    # Distillation logits: batch N over C classes; softmax over dim=1 (classes).
    # C=128 keeps the class (lane) axis dense; N chosen so the row grid has a
    # ragged final tile.  (For the literal tiny module shapes, e.g. (8, 32),
    # plain XLA is faster than any kernel -- this kernel targets real batches.)
    N, C = 200, 128
    temperature = 2.0
    student = jax.random.normal(k1, (N, C), dtype=jnp.float32)
    teacher = jax.random.normal(k2, (N, C), dtype=jnp.float32)

    # tile_n=64 exercises a 4-step pipelined grid (incl. ragged last tile) at this
    # demo size; production sizes fall back to the VMEM-budgeted auto tile.
    loss = interactive_kl_loss(student, teacher, temperature, tile_n=64)
    loss = jax.block_until_ready(loss)

    ref = _reference(student, teacher, temperature)
    assert jnp.allclose(loss, ref, atol=1e-6, rtol=1e-4), (loss, ref)
    print("KERNEL_OK")
</pallas_src>

<mosaic_0001>
module attributes {stable_mosaic.version = 11 : i64} {
  func.func @_kl_kernel(%arg0: i32, %arg1: memref<64x128xf32, #tpu.memory_space<vmem>>, %arg2: memref<64x128xf32, #tpu.memory_space<vmem>>, %arg3: memref<1x1x1xf32, #tpu.memory_space<vmem>>) attributes {dimension_semantics = [#tpu.dimension_semantics<parallel>], iteration_bounds = array<i64: 4>, scalar_prefetch = 0 : i64, scratch_operands = 0 : i64, tpu.core_type = #tpu.core_type<tc>, window_params = [{transform_indices = @transform_0, window_bounds = array<i64: 64, 128>}, {transform_indices = @transform_1, window_bounds = array<i64: 64, 128>}, {transform_indices = @transform_2, window_bounds = array<i64: 1, 1, 1>}]} {
    %c0 = arith.constant 0 : index
    %c0_0 = arith.constant 0 : index
    %0 = vector.load %arg1[%c0, %c0_0] : memref<64x128xf32, #tpu.memory_space<vmem>>, vector<64x128xf32>
    %cst = arith.constant 5.000000e-01 : f32
    %1 = vector.broadcast %cst : f32 to vector<64x128xf32>
    %2 = arith.mulf %0, %1 : vector<64x128xf32>
    %c0_1 = arith.constant 0 : index
    %c0_2 = arith.constant 0 : index
    %3 = vector.load %arg2[%c0_1, %c0_2] : memref<64x128xf32, #tpu.memory_space<vmem>>, vector<64x128xf32>
    %cst_3 = arith.constant 5.000000e-01 : f32
    %4 = vector.broadcast %cst_3 : f32 to vector<64x128xf32>
    %5 = arith.mulf %3, %4 : vector<64x128xf32>
    %cst_4 = arith.constant dense<0xFF800000> : vector<64xf32>
    %6 = vector.multi_reduction <maximumf>, %2, %cst_4 [1] : vector<64x128xf32> to vector<64xf32>
    %7 = vector.shape_cast %6 : vector<64xf32> to vector<64x1xf32>
    %8 = vector.broadcast %7 : vector<64x1xf32> to vector<64x128xf32>
    %9 = arith.subf %2, %8 : vector<64x128xf32>
    %10 = math.exp %9 : vector<64x128xf32>
    %cst_5 = arith.constant dense<0.000000e+00> : vector<64xf32>
    %11 = vector.multi_reduction <add>, %10, %cst_5 [1] : vector<64x128xf32> to vector<64xf32>
    %12 = vector.shape_cast %11 : vector<64xf32> to vector<64x1xf32>
    %13 = math.log %12 : vector<64x1xf32>
    %14 = vector.broadcast %13 : vector<64x1xf32> to vector<64x128xf32>
    %15 = arith.subf %9, %14 : vector<64x128xf32>
    %cst_6 = arith.constant dense<0xFF800000> : vector<64xf32>
    %16 = vector.multi_reduction <maximumf>, %5, %cst_6 [1] : vector<64x128xf32> to vector<64xf32>
    %17 = vector.shape_cast %16 : vector<64xf32> to vector<64x1xf32>
    %18 = vector.broadcast %17 : vector<64x1xf32> to vector<64x128xf32>
    %19 = arith.subf %5, %18 : vector<64x128xf32>
    %20 = math.exp %19 : vector<64x128xf32>
    %cst_7 = arith.constant dense<0.000000e+00> : vector<64xf32>
    %21 = vector.multi_reduction <add>, %20, %cst_7 [1] : vector<64x128xf32> to vector<64xf32>
    %22 = vector.shape_cast %21 : vector<64xf32> to vector<64x1xf32>
    %23 = arith.subf %19, %15 : vector<64x128xf32>
    %24 = arith.mulf %20, %23 : vector<64x128xf32>
    %cst_8 = arith.constant dense<0.000000e+00> : vector<64xf32>
    %25 = vector.multi_reduction <add>, %24, %cst_8 [1] : vector<64x128xf32> to vector<64xf32>
    %26 = vector.shape_cast %25 : vector<64xf32> to vector<64x1xf32>
    %27 = tpu.reciprocal %22 : vector<64x1xf32> -> vector<64x1xf32>
    %28 = arith.mulf %26, %27 : vector<64x1xf32>
    %29 = math.log %22 : vector<64x1xf32>
    %30 = arith.subf %28, %29 : vector<64x1xf32>
    %c64_i32 = arith.constant 64 : i32
    %31 = arith.muli %arg0, %c64_i32 : i32
    %32 = tpu.iota {dimensions = array<i32: 0>} : vector<64x1xi32>
    %33 = vector.broadcast %31 : i32 to vector<64x1xi32>
    %34 = arith.addi %33, %32 : vector<64x1xi32>
    %c200_i32 = arith.constant 200 : i32
    %35 = vector.broadcast %c200_i32 : i32 to vector<64x1xi32>
    %36 = arith.cmpi slt, %34, %35 : vector<64x1xi32>
    %cst_9 = arith.constant 0.000000e+00 : f32
    %37 = vector.broadcast %cst_9 : f32 to vector<64x1xf32>
    %38 = arith.select %36, %30, %37 : vector<64x1xi1>, vector<64x1xf32>
    %cst_10 = arith.constant dense<0.000000e+00> : vector<1xf32>
    %39 = vector.multi_reduction <add>, %38, %cst_10 [0] : vector<64x1xf32> to vector<1xf32>
    %40 = vector.shape_cast %39 : vector<1xf32> to vector<1x1xf32>
    %c0_11 = arith.constant 0 : index
    %c0_12 = arith.constant 0 : index
    %c0_13 = arith.constant 0 : index
    %41 = vector.load %arg3[%c0_11, %c0_12, %c0_13] : memref<1x1x1xf32, #tpu.memory_space<vmem>>, vector<1x1x1xf32>
    %42 = vector.shape_cast %41 : vector<1x1x1xf32> to vector<1x1xf32>
    %43 = vector.shape_cast %40 : vector<1x1xf32> to vector<1x1x1xf32>
    tpu.vector_store %arg3[%c0_11, %c0_12, %c0_13], %43 {strides = array<i32>} : memref<1x1x1xf32, #tpu.memory_space<vmem>>, vector<1x1x1xf32>,
    return
  }
  func.func @transform_0(%arg0: i32) -> (i32, i32) {
    %c0_i32 = arith.constant 0 : i32
    %c0_i32_0 = arith.constant 0 : i32
    return %arg0, %c0_i32 : i32, i32
  }
  func.func @transform_1(%arg0: i32) -> (i32, i32) {
    %c0_i32 = arith.constant 0 : i32
    %c0_i32_0 = arith.constant 0 : i32
    return %arg0, %c0_i32 : i32, i32
  }
  func.func @transform_2(%arg0: i32) -> (i32, i32, i32) {
    %c0_i32 = arith.constant 0 : i32
    %c0_i32_0 = arith.constant 0 : i32
    %c0_i32_1 = arith.constant 0 : i32
    return %arg0, %c0_i32, %c0_i32_0 : i32, i32, i32
  }
}

</mosaic_0001>

<bundles_post_ra>
// kernel: tpu_custom_call.1
= control target key start
LH: loop header
LB: loop body
LE: loop exit
PB: predicated region body
PF: predicated region fallthrough
CT: control target
= control target key end

     0   :  { %7 = vsyncpa [#allocation3], 0  ;;  %s1143_s0 = inlined_call_operand.hbm [shape: f32[200,128], index: 0, kind: input, shape index: {}]   ;;  %s1144_s1 = inlined_call_operand.hbm [shape: f32[200,128], index: 1, kind: input, shape index: {}]   ;;  %s1145_s2 = inlined_call_operand.vmem [shape: f32[4,1,1], index: 2, kind: output, shape index: {}]  }
   0x1   :  { %9 = vsyncpa [#allocation3 + $0x1], 0 }
   0x2   :  { %10 = vsyncpa [#allocation5], 0 }
   0x3   :  { %12 = vsyncpa [#allocation5 + $0x1], 0  ;;  %s854_s9 = smov 0   ;;  %s856_s10 = smov 0  }
   0x4   :  { %s858_s11 = smov 0   ;;  %s860_s12 = smov 0  }
   0x5 LB: > { %s873_s13 = sadd.s32 4294967295, %s831_s12   ;;  %s876_s14 = sadd.s32 1, %s831_s12   ;;  %s831_s12 = sphi %s860_s12, %s1151_s12   ;;  %s827_s11 = sphi %s858_s11, %s1150_s11   ;;  %s823_s10 = sphi %s856_s10, %s1149_s10   ;;  %s819_s9 = sphi %s854_s9, %s1148_s9  }
   0x6   : > { %s22_s15 = ssub.s32 %s831_s12, %s876_s14  ;;  %s25_s16 = sadd.s32 1, %s827_s11 }
   0x7   : > { %p23_p0 = scmp.eq.s32.totalorder %s22_s15, 0  ;;  %p32_p1 = scmp.ne.s32.totalorder %s827_s11, %s823_s10 }
   0x8   : > { %p33_p2 = scmp.eq.s32.totalorder %s831_s12, 0  ;;  %p38_p3 = scmp.ne.s32.totalorder %s823_s10, %s819_s9 }
   0x9   : > { %s886_s17 = scalar_select %p23_p0, %s827_s11, %s25_s16  }
   0xa   : > { %p888_p4 = por %p33_p2, %p32_p1  ;;  %p39_p5 = scmp.eq.s32.totalorder %s873_s13, 0 }
   0xb   : > { %p596_p7 = scmp.ge.s32.totalorder %s831_s12, 4 }
   0xc   : > { %p893_p6 = por %p39_p5, %p38_p3 }
   0xd   : > { %110 = sbr.rel (%p596_p7) target bundleno = 90 (0x5a), region = 16 }
  0x14   : > { %113 = sbr.rel (!%p888_p4) target bundleno = 55 (0x37), region = 20  ;;  %s114_s20 = sand.u32 (%p888_p4), 1, %s827_s11  }
  0x15   : > { %s598_s21 = sshll.u32 (%p888_p4), %s831_s12, 3  ;;  %s597_s22 = sshll.u32 (%p888_p4), %s114_s20, 6 }
  0x16   : > { %s120_s23 = ssub.s32 (%p888_p4), 25, %s598_s21  ;;  %s905_s26 = scalar_lea.sflag (%p888_p4), [#allocation3], %s114_s20 }
  0x17   : > { %p121_p8 = scmp.lt.s32.totalorder (%p888_p4), %s120_s23, 8  ;;  %s118_s27 = scalar_lea.vmem (%p888_p4), [#allocation2], %s597_s22 }
  0x1b   : > { %s1153_s23 = smov (!%p121_p8, %s120_s23), 8 }
  0x1c   : > { %s902_s24 = sshll.u32 %s1153_s23, 7 }
  0x1d   : > { %s125_s25 = ssub.s32 1024, %s902_s24 }
  0x1e   : > { %126 = vsyncadd %s905_s26, %s125_s25  ;;  %p600_p9 = scmp.ne.s32.totalorder %s902_s24, 0  ;;  %s617_s28 = sshll.u32 %s831_s12, 10 }
  0x1f   : > { %s913_s3 = scalar_lea.hbm %s1143_s0, %s617_s28  ;;  %s131_s4 = sshll.u32 %s118_s27, 4  ;;  %s915_s4 = int_to_ptr.vmem [resolvable:$true] %s131_s4 }
  0x20   : > { %s737_s5 = scalar_lea.hbm %s913_s3, %s902_s24  ;;  %s741_s8 = scalar_lea.hbm %s1143_s0, 3200 }
  0x21   : > { %p738_p10 = scmp.ne.s32.totalorder %s913_s3, %s737_s5  ;;  %p742_p13 = scmp.lt.u32.totalorder %s913_s3, %s1143_s0 }
  0x22   : > { %p743_p0 = scmp.lt.u32.totalorder %s741_s8, %s737_s5  ;;  %p745_p2 = scmp.lt.u32.totalorder %s737_s5, %s913_s3 }
  0x23   : > { %p739_p11 = pnand %p738_p10, %p600_p9 }
  0x24   : > { %p744_p1 = por %p743_p0, %p742_p13 }
  0x25   : > { %p740_p12 = pneg %p739_p11 }
  0x26   : > { %p746_p3 = por %p745_p2, %p744_p1 }
  0x28   : > { %p747_p5 = pnand %p746_p3, %p740_p12 }
  0x2a   : > { %750 = shalt.err (!%p747_p5)
}
  0x2b   : > { %s751_s16 = scalar_lea.vmem %s915_s4, %s902_s24  ;;  %s833_s20 = smov [#allocation2]  }
  0x2c   : > { %p752_p7 = scmp.ne.s32.totalorder %s915_s4, %s751_s16  ;;  %s755_s21 = sshll.u32 %s833_s20, 4  ;;  %s756_s21 = int_to_ptr.vmem [resolvable:$false] %s755_s21 }
  0x2d   : > { %s757_s22 = scalar_lea.vmem %s756_s21, 2048  ;;  %p758_p11 = scmp.lt.s32.totalorder %s915_s4, %s756_s21 }
  0x2e   : > { %p753_p8 = pnand %p752_p7, %p600_p9  ;;  %p759_p13 = scmp.lt.s32.totalorder %s757_s22, %s751_s16 }
  0x30   : > { %p754_p10 = pneg %p753_p8  ;;  %p760_p0 = por %p759_p13, %p758_p11 }
  0x32   : > { %p761_p1 = pnand %p760_p0, %p754_p10 }
  0x34   : > { %764 = shalt.err (!%p761_p1)
}
  0x35   : > { %s834_s23 = smov 128   ;;  %s835_s25 = smov 8  }
  0x36   : > { %137 = dma.hbm_to_vmem [thread:$0]  (%p600_p9), %s913_s3, %s902_s24, %s915_s4, %s905_s26, %s834_s23, %s834_s23, %s835_s25  }
  0x37 PF: > { %140 = sbr.rel (!%p888_p4) target bundleno = 90 (0x5a), region = 24  ;;  %s141_s27 = sand.u32 (%p888_p4), 1, %s827_s11  }
  0x38   : > { %s605_s28 = sshll.u32 (%p888_p4), %s831_s12, 3  ;;  %s604_s29 = sshll.u32 (%p888_p4), %s141_s27, 6 }
  0x39   : > { %s147_s30 = ssub.s32 (%p888_p4), 25, %s605_s28  ;;  %s949_s7 = scalar_lea.sflag (%p888_p4), [#allocation5], %s141_s27 }
  0x3a   : > { %p148_p12 = scmp.lt.s32.totalorder (%p888_p4), %s147_s30, 8  ;;  %s145_s24 = scalar_lea.vmem (%p888_p4), [#allocation4], %s604_s29 }
  0x3e   : > { %s1155_s30 = smov (!%p148_p12, %s147_s30), 8 }
  0x3f   : > { %s946_s5 = sshll.u32 %s1155_s30, 7 }
  0x40   : > { %s152_s6 = ssub.s32 1024, %s946_s5 }
  0x41   : > { %153 = vsyncadd %s949_s7, %s152_s6  ;;  %p607_p4 = scmp.ne.s32.totalorder %s946_s5, 0  ;;  %s618_s18 = sshll.u32 %s831_s12, 10 }
  0x42   : > { %s957_s4 = scalar_lea.hbm %s1144_s1, %s618_s18  ;;  %s158_s8 = sshll.u32 %s145_s24, 4  ;;  %s959_s8 = int_to_ptr.vmem [resolvable:$true] %s158_s8 }
  0x43   : > { %s765_s9 = scalar_lea.hbm %s957_s4, %s946_s5  ;;  %s769_s20 = scalar_lea.hbm %s1144_s1, 3200 }
  0x44   : > { %p766_p9 = scmp.ne.s32.totalorder %s957_s4, %s765_s9  ;;  %p770_p5 = scmp.lt.u32.totalorder %s957_s4, %s1144_s1 }
  0x45   : > { %p771_p7 = scmp.lt.u32.totalorder %s769_s20, %s765_s9  ;;  %p773_p10 = scmp.lt.u32.totalorder %s765_s9, %s957_s4 }
  0x46   : > { %p767_p2 = pnand %p766_p9, %p607_p4 }
  0x47   : > { %p772_p8 = por %p771_p7, %p770_p5 }
  0x48   : > { %p768_p3 = pneg %p767_p2 }
  0x49   : > { %p774_p11 = por %p773_p10, %p772_p8 }
  0x4b   : > { %p775_p13 = pnand %p774_p11, %p768_p3 }
  0x4d   : > { %778 = shalt.err (!%p775_p13)
}
  0x4e   : > { %s779_s23 = scalar_lea.vmem %s959_s8, %s946_s5  ;;  %s836_s25 = smov [#allocation4]  }
  0x4f   : > { %p780_p0 = scmp.ne.s32.totalorder %s959_s8, %s779_s23  ;;  %s783_s27 = sshll.u32 %s836_s25, 4  ;;  %s784_s27 = int_to_ptr.vmem [resolvable:$false] %s783_s27 }
  0x50   : > { %s785_s28 = scalar_lea.vmem %s784_s27, 2048  ;;  %p786_p9 = scmp.lt.s32.totalorder %s959_s8, %s784_s27 }
  0x51   : > { %p781_p1 = pnand %p780_p0, %p607_p4  ;;  %p787_p2 = scmp.lt.s32.totalorder %s785_s28, %s779_s23 }
  0x53   : > { %p782_p12 = pneg %p781_p1  ;;  %p788_p5 = por %p787_p2, %p786_p9 }
  0x55   : > { %p789_p7 = pnand %p788_p5, %p782_p12 }
  0x57   : > { %792 = shalt.err (!%p789_p7)
}
  0x58   : > { %s837_s29 = smov 128   ;;  %s838_s30 = smov 8  }
  0x59   : > { %164 = dma.hbm_to_vmem [thread:$0]  (%p607_p4), %s957_s4, %s946_s5, %s959_s8, %s949_s7, %s837_s29, %s837_s29, %s838_s30  }
  0x5a PF: > { %p611_p3 = scmp.ge.s32.totalorder %s831_s12, 1  ;;  %p166_p8 = scmp.lt.s32.totalorder %s831_s12, 5 }
  0x5c   : > { %p167_p10 = pnand %p611_p3, %p166_p8 }
  0x5d   : > { %s172_s6 = sand.u32 (!%p167_p10), 1, %s823_s10  }
  0x5e   : > { %170 = sbr.rel (%p167_p10) target bundleno = 609 (0x261), region = 28  ;;  %s612_s24 = sshll.u32 (!%p167_p10), %s172_s6, 6 }
  0x5f   : > { %s173_s18 = scalar_lea.sflag (!%p167_p10), [#allocation3], %s172_s6  ;;  %s176_s26 = scalar_lea.vmem (!%p167_p10), [#allocation2], %s612_s24 }
  0x65   : > { %810 = dma.done.wait (%p893_p6), %s173_s18, 1024  }
  0x66   : > { %812 = vsyncadd (%p893_p6), %s173_s18, 4294966272  ;;  %s182_s5 = scalar_lea.sflag [#allocation5], %s172_s6  ;;  %s993_s7 = scalar_lea.vmem [#allocation4], %s612_s24 }
  0x67   : > { %814 = dma.done.wait (%p893_p6), %s182_s5, 1024  }
  0x68   : > { %816 = vsyncadd (%p893_p6), %s182_s5, 4294966272  ;;  %v224_v0 = vld [vmem:[%s176_s26 + $0x10] sm:$0xff]  ;;  %v222_v1 = vld [vmem:[%s176_s26] sm:$0xff]  ;;  %s614_s12 = sshll.u32 %s873_s13, 6  ;;  %p219_p6 = scmp.lt.s32.totalorder %s873_s13, 3  ;;  %vm510_vm8 = vcmask 0  }
  0x69   : > { %v225_v2 = vld [vmem:[%s176_s26 + $0x18] sm:$0xff]  ;;  %v232_v3 = vmul.f32 0.5, %v224_v0  ;;  %v230_v4 = vmul.f32 0.5, %v222_v1  ;;  %v223_v5 = vld [vmem:[%s176_s26 + $0x8] sm:$0xff]  ;;  %v226_v9 = vld [vmem:[%s176_s26 + $0x20] sm:$0xff] }
  0x6a   : > { %v233_v6 = vmul.f32 0.5, %v225_v2  ;;  %v231_v7 = vmul.f32 0.5, %v223_v5  ;;  %v227_v8 = vld [vmem:[%s176_s26 + $0x28] sm:$0xff]  ;;  %v234_v11 = vmul.f32 0.5, %v226_v9  ;;  %v229_v12 = vld [vmem:[%s176_s26 + $0x38] sm:$0xff]  ;;  %v228_v13 = vld [vmem:[%s176_s26 + $0x30] sm:$0xff] }
  0x6b   : > { %258 = vmax.xlane.f32.xlu1 %v232_v3  ;;  %254 = vmax.xlane.f32.xlu0 %v230_v4  ;;  %v235_v10 = vmul.f32 0.5, %v227_v8  ;;  %v237_v14 = vmul.f32 0.5, %v229_v12  ;;  %v236_v15 = vmul.f32 0.5, %v228_v13  ;;  %v239_v16 = vld [vmem:[%s993_s7 + $0x8] sm:$0xff]  ;;  %v241_v18 = vld [vmem:[%s993_s7 + $0x18] sm:$0xff]  ;;  %v238_v20 = vld [vmem:[%s993_s7] sm:$0xff] }
  0x6c   : > { %v247_v17 = vmul.f32 0.5, %v239_v16  ;;  %v249_v19 = vmul.f32 0.5, %v241_v18  ;;  %v246_v21 = vmul.f32 0.5, %v238_v20  ;;  %v243_v22 = vld [vmem:[%s993_s7 + $0x28] sm:$0xff]  ;;  %v240_v24 = vld [vmem:[%s993_s7 + $0x10] sm:$0xff]  ;;  %v242_v28 = vld [vmem:[%s993_s7 + $0x20] sm:$0xff] }
  0x6d   : > { %v1003_v23 = vmul.f32 0.5, %v243_v22  ;;  %v1006_v25 = vmul.f32 0.5, %v240_v24  ;;  %v244_v26 = vld [vmem:[%s993_s7 + $0x30] sm:$0xff]  ;;  %v1014_v29 = vmul.f32 0.5, %v242_v28  ;;  %v245_v50 = vld [vmem:[%s993_s7 + $0x38] sm:$0xff]  ;;  %s1157_s13 = smov (!%p219_p6, %s873_s13), 3 }
  0x6e   : > { %v1011_v27 = vmul.f32 0.5, %v244_v26  ;;  %v1042_v56 = vmul.f32 0.5, %v245_v50  ;;  %s221_s4 = scalar_lea.vmem %s1145_s2, %s1157_s13 }
  0x6f   : > { %260 = vmax.xlane.f32.xlu1 %v233_v6  ;;  %256 = vmax.xlane.f32.xlu0 %v231_v7 }
  0x73   : > { %264 = vmax.xlane.f32.xlu1 %v235_v10  ;;  %262 = vmax.xlane.f32.xlu0 %v234_v11 }
  0x77   : > { %268 = vmax.xlane.f32.xlu1 %v237_v14  ;;  %266 = vmax.xlane.f32.xlu0 %v236_v15 }
  0x7b   : > { %336 = vmax.xlane.f32.xlu1 %v247_v17  ;;  %334 = vmax.xlane.f32.xlu0 %v246_v21 }
  0x7f   : > { %340 = vmax.xlane.f32.xlu1 %v249_v19  ;;  %338 = vmax.xlane.f32.xlu0 %v1006_v25 }
  0x83   : > { %344 = vmax.xlane.f32.xlu1 %v1003_v23  ;;  %342 = vmax.xlane.f32.xlu0 %v1014_v29 }
  0x87   : > { %346 = vmax.xlane.f32.xlu1 %v1011_v27 }
  0xf8   : > { %v259_v30 = vpop.xlane.xlu1 %258  ;;  %v255_v31 = vpop.xlane.xlu0 %254 }
  0xf9   : > { %v1018_v32 = vsub.f32 %v230_v4, %v255_v31  ;;  %v1021_v34 = vsub.f32 %v232_v3, %v259_v30 }
  0xfb   : > { %v278_v33 = vmul.f32 1.442695, %v1018_v32  ;;  %v282_v39 = vmul.f32 1.442695, %v1021_v34 }
  0xfc   : > { %v261_v35 = vpop.xlane.xlu1 %260  ;;  %v257_v36 = vpop.xlane.xlu0 %256 }
  0xfd   : > { %v1023_v37 = vsub.f32 %v231_v7, %v257_v36  ;;  %657 = vpow2.f32 %v278_v33  ;;  %v1027_v40 = vsub.f32 %v233_v6, %v261_v35 }
  0xff   : > { %v280_v38 = vmul.f32 1.442695, %v1023_v37  ;;  %v284_v45 = vmul.f32 1.442695, %v1027_v40 }
 0x100   : > { %v265_v41 = vpop.xlane.xlu1 %264  ;;  %v263_v42 = vpop.xlane.xlu0 %262 }
 0x101   : > { %v1029_v43 = vsub.f32 %v235_v10, %v265_v41  ;;  %659 = vpow2.f32 %v280_v38  ;;  %v1033_v47 = vsub.f32 %v234_v11, %v263_v42 }
 0x102   : > { %661 = vpow2.f32 %v282_v39 }
 0x103   : > { %v288_v44 = vmul.f32 1.442695, %v1029_v43  ;;  %v286_v53 = vmul.f32 1.442695, %v1033_v47 }
 0x104   : > { %v269_v46 = vpop.xlane.xlu1 %268  ;;  %v267_v49 = vpop.xlane.xlu0 %266 }
 0x105   : > { %663 = vpow2.f32 %v288_v44  ;;  %v1035_v48 = vsub.f32 %v237_v14, %v269_v46  ;;  %v1040_v54 = vsub.f32 %v236_v15, %v267_v49 }
 0x106   : > { %665 = vpow2.f32 %v284_v45 }
 0x107   : > { %v292_v51 = vmul.f32 1.442695, %v1035_v48  ;;  %v658_v52 = vpop.eup %657  ;;  %v290_v60 = vmul.f32 1.442695, %v1040_v54 }
 0x108   : > { %v337_v55 = vpop.xlane.xlu1 %336  ;;  %294 = vadd.xlane.f32.xlu1 %v658_v52  ;;  %v335_v62 = vpop.xlane.xlu0 %334 }
 0x109   : > { %667 = vpow2.f32 %v292_v51  ;;  %v1044_v57 = vsub.f32 %v247_v17, %v337_v55  ;;  %v1051_v0 = vsub.f32 %v246_v21, %v335_v62 }
 0x10a   : > { %669 = vpow2.f32 %v286_v53 }
 0x10b   : > { %v360_v58 = vmul.f32 1.442695, %v1044_v57  ;;  %v660_v59 = vpop.eup %659  ;;  %v358_v4 = vmul.f32 1.442695, %v1051_v0 }
 0x10c   : > { %v341_v61 = vpop.xlane.xlu1 %340  ;;  %348 = vmax.xlane.f32.xlu1 %v1042_v56  ;;  %296 = vadd.xlane.f32.xlu0 %v660_v59  ;;  %v662_v1 = vpop.eup %661 }
 0x10d   : > { %671 = vpow2.f32 %v360_v58  ;;  %v1049_v63 = vsub.f32 %v249_v19, %v341_v61  ;;  %v339_v6 = vpop.xlane.xlu0 %338 }
 0x10e   : > { %673 = vpow2.f32 %v290_v60  ;;  %v1059_v8 = vsub.f32 %v1006_v25, %v339_v6 }
 0x10f   : > { %v664_v2 = vpop.eup %663  ;;  %v364_v3 = vmul.f32 1.442695, %v1049_v63 }
 0x110   : > { %v345_v5 = vpop.xlane.xlu1 %344  ;;  %304 = vadd.xlane.f32.xlu1 %v664_v2  ;;  %298 = vadd.xlane.f32.xlu0 %v662_v1  ;;  %v666_v9 = vpop.eup %665  ;;  %v362_v12 = vmul.f32 1.442695, %v1059_v8 }
 0x111   : > { %675 = vpow2.f32 %v364_v3  ;;  %v1056_v7 = vsub.f32 %v1003_v23, %v345_v5  ;;  %v343_v13 = vpop.xlane.xlu0 %342 }
 0x112   : > { %677 = vpow2.f32 %v358_v4  ;;  %v1064_v14 = vsub.f32 %v1014_v29, %v343_v13 }
 0x113   : > { %v668_v10 = vpop.eup %667  ;;  %v368_v11 = vmul.f32 1.442695, %v1056_v7 }
 0x114   : > { %308 = vadd.xlane.f32.xlu1 %v668_v10  ;;  %300 = vadd.xlane.f32.xlu0 %v666_v9  ;;  %v670_v15 = vpop.eup %669  ;;  %v347_v17 = vpop.xlane.xlu1 %346  ;;  %v366_v19 = vmul.f32 1.442695, %v1064_v14 }
 0x115   : > { %679 = vpow2.f32 %v368_v11  ;;  %v1067_v18 = vsub.f32 %v1011_v27, %v347_v17 }
 0x116   : > { %681 = vpow2.f32 %v362_v12 }
 0x117   : > { %v672_v16 = vpop.eup %671  ;;  %v370_v22 = vmul.f32 1.442695, %v1067_v18  ;;  %683 = vpow2.f32 %v366_v19 }
 0x118   : > { %302 = vadd.xlane.f32.xlu0 %v670_v15  ;;  %376 = vadd.xlane.f32.xlu1 %v672_v16  ;;  %v674_v20 = vpop.eup %673 }
 0x119   : > { %685 = vpow2.f32 %v370_v22  ;;  %v463_v22 = vlaneseq }
 0x11b   : > { %v1070_v21 = vpop.eup %675 }
 0x11c   : > { %306 = vadd.xlane.f32.xlu0 %v674_v20  ;;  %380 = vadd.xlane.f32.xlu1 %v1070_v21  ;;  %v678_v23 = vpop.eup %677 }
 0x11f   : > { %v1074_v24 = vpop.eup %679 }
 0x120   : > { %374 = vadd.xlane.f32.xlu0 %v678_v23  ;;  %384 = vadd.xlane.f32.xlu1 %v1074_v24  ;;  %v682_v25 = vpop.eup %681 }
 0x121   : > { %v1077_v26 = vpop.eup %683 }
 0x123   : > { %v1080_v27 = vpop.eup %685 }
 0x124   : > { %378 = vadd.xlane.f32.xlu0 %v682_v25 }
 0x128   : > { %382 = vadd.xlane.f32.xlu0 %v1077_v26 }
 0x12c   : > { %386 = vadd.xlane.f32.xlu0 %v1080_v27 }
 0x195   : > { %v295_v28 = vpop.xlane.xlu1 %294 }
 0x196   : > { %687 = vlog2.f32 %v295_v28 }
 0x199   : > { %v349_v29 = vpop.xlane.xlu1 %348  ;;  %v297_v30 = vpop.xlane.xlu0 %296 }
 0x19a   : > { %v357_v31 = vsub.f32 %v1042_v56, %v349_v29  ;;  %689 = vlog2.f32 %v297_v30  ;;  %v1107_v30 = vstv %s614_s12 }
 0x19c   : > { %v372_v33 = vmul.f32 1.442695, %v357_v31 }
 0x19d   : > { %v305_v35 = vpop.xlane.xlu1 %304  ;;  %v299_v36 = vpop.xlane.xlu0 %298 }
 0x19e   : > { %691 = vpow2.f32 %v372_v33 }
 0x19f   : > { %693 = vlog2.f32 %v305_v35 }
 0x1a0   : > { %v688_v38 = vpop.eup %687  ;;  %695 = vlog2.f32 %v299_v36 }
 0x1a1   : > { %v311_v39 = vmul.f32 0.6931472, %v688_v38  ;;  %v309_v41 = vpop.xlane.xlu1 %308  ;;  %v301_v42 = vpop.xlane.xlu0 %300 }
 0x1a2   : > { %697 = vlog2.f32 %v309_v41 }
 0x1a3   : > { %v326_v44 = vsub.f32 %v1018_v32, %v311_v39  ;;  %699 = vlog2.f32 %v301_v42 }
 0x1a4   : > { %v690_v45 = vpop.eup %689 }
 0x1a5   : > { %v313_v46 = vmul.f32 0.6931472, %v690_v45  ;;  %v303_v49 = vpop.xlane.xlu0 %302  ;;  %v390_v51 = vsub.f32 %v1051_v0, %v326_v44 }
 0x1a6   : > { %701 = vlog2.f32 %v303_v49 }
 0x1a7   : > { %v327_v50 = vsub.f32 %v1023_v37, %v313_v46  ;;  %v398_v60 = vmul.f32 %v678_v23, %v390_v51 }
 0x1a8   : > { %v692_v52 = vpop.eup %691 }
 0x1a9   : > { %v694_v53 = vpop.eup %693  ;;  %388 = vadd.xlane.f32.xlu1 %v692_v52  ;;  %v307_v55 = vpop.xlane.xlu0 %306  ;;  %v391_v56 = vsub.f32 %v1044_v57, %v327_v50 }
 0x1aa   : > { %v696_v58 = vpop.eup %695  ;;  %703 = vlog2.f32 %v307_v55  ;;  %v321_v62 = vmul.f32 0.6931472, %v694_v53 }
 0x1ab   : > { %v315_v59 = vmul.f32 0.6931472, %v696_v58  ;;  %v399_v32 = vmul.f32 %v672_v16, %v391_v56 }
 0x1ac   : > { %v698_v61 = vpop.eup %697  ;;  %v331_v4 = vsub.f32 %v1029_v43, %v321_v62 }
 0x1ad   : > { %v700_v1 = vpop.eup %699  ;;  %v328_v2 = vsub.f32 %v1021_v34, %v315_v59  ;;  %406 = vadd.xlane.f32.xlu1 %v398_v60  ;;  %408 = vadd.xlane.f32.xlu0 %v399_v32  ;;  %v325_v5 = vmul.f32 0.6931472, %v698_v61 }
 0x1ae   : > { %v317_v37 = vmul.f32 0.6931472, %v700_v1 }
 0x1af   : > { %v392_v0 = vsub.f32 %v1059_v8, %v328_v2  ;;  %v333_v34 = vsub.f32 %v1035_v48, %v325_v5  ;;  %v395_v8 = vsub.f32 %v1056_v7, %v331_v4  ;;  %v375_v7 = vpop.xlane.xlu0 %374 }
 0x1b0   : > { %v702_v3 = vpop.eup %701  ;;  %v329_v57 = vsub.f32 %v1027_v40, %v317_v37 }
 0x1b1   : > { %v319_v6 = vmul.f32 0.6931472, %v702_v3  ;;  %v400_v9 = vmul.f32 %v682_v25, %v392_v0  ;;  %v397_v17 = vsub.f32 %v357_v31, %v333_v34 }
 0x1b2   : > { %v393_v10 = vsub.f32 %v1049_v63, %v329_v57  ;;  %v403_v63 = vmul.f32 %v1074_v24, %v395_v8 }
 0x1b3   : > { %v330_v11 = vsub.f32 %v1033_v47, %v319_v6  ;;  %410 = vadd.xlane.f32.xlu0 %v400_v9  ;;  %v405_v19 = vmul.f32 %v692_v52, %v397_v17  ;;  %v379_v20 = vpop.xlane.xlu0 %378 }
 0x1b4   : > { %v704_v12 = vpop.eup %703  ;;  %v401_v13 = vmul.f32 %v1070_v21, %v393_v10 }
 0x1b5   : > { %v323_v15 = vmul.f32 0.6931472, %v704_v12  ;;  %v394_v43 = vsub.f32 %v1064_v14, %v330_v11  ;;  %v377_v14 = vpop.xlane.xlu1 %376 }
 0x1b6   : > { %412 = vadd.xlane.f32.xlu1 %v401_v13  ;;  %705 = vrcp.f32 %v377_v14 }
 0x1b7   : > { %v332_v40 = vsub.f32 %v1040_v54, %v323_v15  ;;  %v402_v16 = vmul.f32 %v1077_v26, %v394_v43  ;;  %707 = vlog2.f32 %v377_v14  ;;  %v383_v54 = vpop.xlane.xlu0 %382 }
 0x1b8   : > { %709 = vrcp.f32 %v375_v7 }
 0x1b9   : > { %414 = vadd.xlane.f32.xlu0 %v402_v16  ;;  %v396_v47 = vsub.f32 %v1067_v18, %v332_v40  ;;  %v381_v21 = vpop.xlane.xlu1 %380  ;;  %711 = vlog2.f32 %v375_v7  ;;  %v1103_v18 = vshrl.u32 %v463_v22, 7 }
 0x1ba   : > { %416 = vadd.xlane.f32.xlu1 %v403_v63  ;;  %713 = vlog2.f32 %v379_v20 }
 0x1bb   : > { %v404_v48 = vmul.f32 %v1080_v27, %v396_v47  ;;  %715 = vrcp.f32 %v379_v20  ;;  %v387_v24 = vpop.xlane.xlu0 %386  ;;  %v465_v28 = vadd.s32 8, %v1103_v18  ;;  %v466_v36 = vadd.s32 16, %v1103_v18 }
 0x1bc   : > { %717 = vlog2.f32 %v381_v21  ;;  %v473_v41 = vadd.s32 %v1107_v30, %v1103_v18  ;;  %v467_v46 = vadd.s32 24, %v1103_v18  ;;  %v468_v53 = vadd.s32 32, %v1103_v18 }
 0x1bd   : > { %418 = vadd.xlane.f32.xlu0 %v404_v48  ;;  %v385_v23 = vpop.xlane.xlu1 %384  ;;  %719 = vrcp.f32 %v381_v21  ;;  %v474_v42 = vadd.s32 %v1107_v30, %v465_v28  ;;  %v475_v50 = vadd.s32 %v1107_v30, %v466_v36  ;;  %v469_v62 = vadd.s32 40, %v1103_v18 }
 0x1be   : > { %420 = vadd.xlane.f32.xlu1 %v405_v19  ;;  %721 = vlog2.f32 %v385_v23  ;;  %vm481_vm0 = vcmp.lt.s32.totalorder %v473_v41, 200  ;;  %v476_v32 = vadd.s32 %v1107_v30, %v467_v46  ;;  %v477_v4 = vadd.s32 %v1107_v30, %v468_v53 }
 0x1bf   : > { %723 = vlog2.f32 %v383_v54  ;;  %vm482_vm1 = vcmp.lt.s32.totalorder %v474_v42, 200  ;;  %vm483_vm2 = vcmp.lt.s32.totalorder %v475_v50, 200  ;;  %v470_v9 = vadd.s32 48, %v1103_v18 }
 0x1c0   : > { %v706_v26 = vpop.eup %705  ;;  %725 = vrcp.f32 %v383_v54  ;;  %vm484_vm3 = vcmp.lt.s32.totalorder %v476_v32, 200  ;;  %v478_v13 = vadd.s32 %v1107_v30, %v469_v62  ;;  %v471_v15 = vadd.s32 56, %v1103_v18 }
 0x1c1   : > { %v708_v27 = vpop.eup %707  ;;  %727 = vrcp.f32 %v385_v23  ;;  %vm485_vm4 = vcmp.lt.s32.totalorder %v477_v4, 200  ;;  %v479_v14 = vadd.s32 %v1107_v30, %v470_v9 }
 0x1c2   : > { %v710_v29 = vpop.eup %709  ;;  %v441_v45 = vmul.f32 0.6931472, %v708_v27  ;;  %729 = vlog2.f32 %v387_v24  ;;  %vm486_vm5 = vcmp.lt.s32.totalorder %v478_v13, 200  ;;  %v480_v18 = vadd.s32 %v1107_v30, %v471_v15 }
 0x1c3   : > { %v712_v31 = vpop.eup %711  ;;  %vm487_vm6 = vcmp.lt.s32.totalorder %v479_v14, 200 }
 0x1c4   : > { %v439_v44 = vmul.f32 0.6931472, %v712_v31  ;;  %v714_v49 = vpop.eup %713  ;;  %vm488_vm7 = vcmp.lt.s32.totalorder %v480_v18, 200 }
 0x1c5   : > { %v716_v55 = vpop.eup %715  ;;  %v443_v59 = vmul.f32 0.6931472, %v714_v49 }
 0x1c6   : > { %v718_v58 = vpop.eup %717 }
 0x1c7   : > { %v720_v61 = vpop.eup %719  ;;  %v445_v57 = vmul.f32 0.6931472, %v718_v58 }
 0x1c8   : > { %v722_v1 = vpop.eup %721 }
 0x1c9   : > { %v724_v5 = vpop.eup %723  ;;  %v449_v40 = vmul.f32 0.6931472, %v722_v1 }
 0x1ca   : > { %v726_v11 = vpop.eup %725  ;;  %v447_v63 = vmul.f32 0.6931472, %v724_v5 }
 0x1cb   : > { %v728_v43 = vpop.eup %727 }
 0x1cc   : > { %v730_v47 = vpop.eup %729 }
 0x1cd   : > { %v451_v28 = vmul.f32 0.6931472, %v730_v47 }
 0x236   : > { %v389_v25 = vpop.xlane.xlu1 %388 }
 0x237   : > { %731 = vlog2.f32 %v389_v25 }
 0x238   : > { %733 = vrcp.f32 %v387_v24 }
 0x239   : > { %735 = vrcp.f32 %v389_v25 }
 0x23a   : > { %v407_v33 = vpop.xlane.xlu1 %406  ;;  %v409_v35 = vpop.xlane.xlu0 %408 }
 0x23b   : > { %v430_v38 = vmul.f32 %v710_v29, %v407_v33  ;;  %v431_v39 = vmul.f32 %v706_v26, %v409_v35 }
 0x23d   : > { %v454_v51 = vsub.f32 %v430_v38, %v439_v44  ;;  %v455_v52 = vsub.f32 %v431_v39, %v441_v45 }
 0x23f   : > { %v489_v2 = vsel %vm481_vm0, %v454_v51, 0.0  ;;  %v490_v37 = vsel %vm482_vm1, %v455_v52, 0.0 }
 0x240   : > { %v411_v56 = vpop.xlane.xlu0 %410  ;;  %v497_v12 = vadd.f32 %v490_v37, %v489_v2 }
 0x241   : > { %v432_v60 = vmul.f32 %v716_v55, %v411_v56  ;;  %v732_v20 = vpop.eup %731 }
 0x242   : > { %v734_v54 = vpop.eup %733  ;;  %v453_v33 = vmul.f32 0.6931472, %v732_v20 }
 0x243   : > { %v456_v0 = vsub.f32 %v432_v60, %v443_v59  ;;  %v413_v3 = vpop.xlane.xlu1 %412  ;;  %v736_v25 = vpop.eup %735 }
 0x244   : > { %v433_v6 = vmul.f32 %v720_v61, %v413_v3 }
 0x245   : > { %v491_v10 = vsel %vm483_vm2, %v456_v0, 0.0 }
 0x246   : > { %v457_v34 = vsub.f32 %v433_v6, %v445_v57  ;;  %v415_v8 = vpop.xlane.xlu0 %414  ;;  %v498_v48 = vadd.f32 %v497_v12, %v491_v10 }
 0x247   : > { %v417_v16 = vpop.xlane.xlu1 %416  ;;  %v434_v17 = vmul.f32 %v726_v11, %v415_v8 }
 0x248   : > { %v492_v19 = vsel %vm484_vm3, %v457_v34, 0.0  ;;  %v435_v7 = vmul.f32 %v728_v43, %v417_v16 }
 0x249   : > { %v458_v21 = vsub.f32 %v434_v17, %v447_v63  ;;  %v499_v22 = vadd.f32 %v498_v48, %v492_v19 }
 0x24a   : > { %v459_v23 = vsub.f32 %v435_v7, %v449_v40  ;;  %v419_v24 = vpop.xlane.xlu0 %418 }
 0x24b   : > { %v493_v26 = vsel %vm485_vm4, %v458_v21, 0.0  ;;  %v421_v27 = vpop.xlane.xlu1 %420  ;;  %v436_v29 = vmul.f32 %v734_v54, %v419_v24 }
 0x24c   : > { %v500_v31 = vadd.f32 %v499_v22, %v493_v26  ;;  %v437_v35 = vmul.f32 %v736_v25, %v421_v27  ;;  %v494_v36 = vsel %vm486_vm5, %v459_v23, 0.0 }
 0x24d   : > { %v460_v38 = vsub.f32 %v436_v29, %v451_v28 }
 0x24e   : > { %v461_v39 = vsub.f32 %v437_v35, %v453_v33  ;;  %v501_v41 = vadd.f32 %v500_v31, %v494_v36 }
 0x24f   : > { %v495_v42 = vsel %vm487_vm6, %v460_v38, 0.0 }
 0x250   : > { %v502_v30 = vadd.f32 %v501_v41, %v495_v42  ;;  %v496_v44 = vsel %vm488_vm7, %v461_v39, 0.0 }
 0x252   : > { %v503_v45 = vadd.f32 %v502_v30, %v496_v44 }
 0x254   : > { %v504_v46 = vrot.slane %v503_v45, 4 }
 0x256   : > { %v505_v49 = vadd.f32 %v504_v46, %v503_v45 }
 0x258   : > { %v506_v50 = vrot.slane %v505_v49, 2 }
 0x25a   : > { %v507_v51 = vadd.f32 %v506_v50, %v505_v49 }
 0x25c   : > { %v508_v52 = vrot.slane %v507_v51, 1 }
 0x25e   : > { %v509_v53 = vadd.f32 %v508_v52, %v507_v51 }
 0x260   : > { %511 = vst.msk [vmem:[%s221_s4] sm:$0x1] %vm510_vm8, %v509_v53 }
 0x261 PF: > { %p15_p4 = scmp.ge.s32.totalorder %s876_s14, 6   ;;  %s1148_s9 = smov %s823_s10 }
 0x262   : > { %s1149_s10 = smov %s827_s11  ;;  %s1150_s11 = smov %s886_s17 }
 0x263   : > { %s1151_s12 = smov %s876_s14  ;;  %17 = sbr.rel (!%p15_p4) target bundleno = 5 (0x5), region = 81 }
 0x26a   :  { %529 = vsyncpa [#allocation3], 1 }
 0x26b   :  { %531 = vsyncpa [#allocation3 + $0x1], 1 }
 0x26c   :  { %532 = vsyncpa [#allocation5], 1 }
 0x26d   :  { %534 = vsyncpa [#allocation5 + $0x1], 1 }

</bundles_post_ra>
